<compile_context>
chip_gen: v7x
topology: tpu7x:2x2x1
jax: 0.10.0
libtpu: 0.0.40
codegen_flags: <defaults>
</compile_context>

<pallas_src>
import functools
import math

import jax
import jax.numpy as jnp
from jax.experimental import pallas as pl
from jax.experimental.pallas import tpu as pltpu


def _gat_kernel(h_ref, adj_ref, w_ref, out_ref, *, alpha, concat, matmul_dtype):
    """One grid step == a block of G graphs. All blocks live in VMEM."""
    G, N, F_in = h_ref.shape
    F_pad = out_ref.shape[2]          # lane-dense (multiple of 128) output width

    # --- One big MXU matmul for the whole block of graphs -------------------
    # (G, N, F_in) -> (G*N, F_in): free view when N is a multiple of 8.
    h2d = h_ref[...].reshape(G * N, F_in)
    w_ext = w_ref[...]                                     # (F_in, F_pad + 2)
    wh_ext = jnp.dot(h2d.astype(matmul_dtype), w_ext.astype(matmul_dtype),
                     preferred_element_type=jnp.float32)   # (G*N, F_pad + 2)

    # int8 adjacency -> f32 once (dequant-style convert), compared to 0 below.
    adjf = adj_ref[...].astype(jnp.float32)                # (G, N, N)

    # --- Per-graph attention (small (N,N) work, static unroll over G) -------
    for g in range(G):
        wh_g = wh_ext[g * N:(g + 1) * N, :F_pad]           # (N, F_pad)
        wh1 = wh_ext[g * N:(g + 1) * N, F_pad:F_pad + 1]   # (N, 1) == Wh @ a1
        wh2 = wh_ext[g * N:(g + 1) * N, F_pad + 1:F_pad + 2]  # (N, 1) == Wh @ a2

        # e[i, j] = leakyrelu(Wh1[i] + Wh2[j]); the only XLU transpose left is
        # the skinny (N,1)->(1,N) one.
        e = wh1 + wh2.T                                    # (N, N)
        e = jnp.where(e > 0, e, alpha * e)                 # LeakyReLU

        # Adjacency mask (scalar constant, no full_like temp) + stable softmax.
        att = jnp.where(adjf[g] > 0, e, -9e15)
        att = att - jnp.max(att, axis=-1, keepdims=True)
        p = jnp.exp(att)
        p = p * pl.reciprocal(jnp.sum(p, axis=-1, keepdims=True), approx=True)

        # h' = attention @ Wh   (MXU)
        h_prime = jnp.dot(p.astype(matmul_dtype), wh_g.astype(matmul_dtype),
                          preferred_element_type=jnp.float32)  # (N, F_pad)

        if concat:  # ELU, with the exp argument clamped for the dead branch
            h_prime = jnp.where(h_prime > 0, h_prime,
                                jnp.exp(jnp.minimum(h_prime, 0.0)) - 1.0)

        out_ref[g] = h_prime.astype(out_ref.dtype)


def _pick_graphs_per_step(B, N, F_in, F_pad, *, vmem_budget_bytes=8 << 20,
                          target_rows=512):
    """Choose G (graphs per grid step): fold enough rows to feed the MXU, stay
    within a modest double-buffered VMEM budget, keep >=2 grid steps when
    possible (pipelining + v7x megacore), and require G | B."""
    per_graph = 4 * N * (F_in + F_pad) + N * N      # f32 h + f32 out + i8 adj
    g = min(B,
            max(1, target_rows // max(N, 1)),
            max(1, vmem_budget_bytes // (2 * max(per_graph, 1))))
    if B >= 2:
        g = max(1, min(g, B // 2))
    while B % g:
        g -= 1
    return g


def graph_attention_head(h, adj, W, a, *, alpha=0.2, concat=True,
                         matmul_dtype=jnp.float32):
    """Pallas implementation of GraphAttentionHead.forward (eval mode).

    h:   (B, N, F_in)  float32
    adj: (B, N, N)     float32 (>0 means edge present)
    W:   (F_in, F_out) float32
    a:   (2*F_out, 1)  float32
    """
    B, N, F_in = h.shape
    F_out = W.shape[1]
    F_pad = ((F_out + 127) // 128) * 128           # lane-dense output width

    # Fold a1/a2 into the weight matmul: W_ext = [W | zero-pad | W@a1 | W@a2].
    wa1 = W @ a[:F_out, :]                          # (F_in, 1)
    wa2 = W @ a[F_out:, :]                          # (F_in, 1)
    W_pad = jnp.zeros((F_in, F_pad), W.dtype).at[:, :F_out].set(W)
    W_ext = jnp.concatenate([W_pad, wa1, wa2], axis=1)   # (F_in, F_pad + 2)

    # Shrink the dominant HBM stream: adjacency as an int8 edge mask.
    adj_mask = (adj > 0).astype(jnp.int8)

    G = _pick_graphs_per_step(B, N, F_in, F_pad)
    grid = (B // G,)

    kernel = functools.partial(_gat_kernel, alpha=float(alpha),
                               concat=bool(concat), matmul_dtype=matmul_dtype)

    out = pl.pallas_call(
        kernel,
        out_shape=jax.ShapeDtypeStruct((B, N, F_pad), jnp.float32),
        grid_spec=pltpu.PrefetchScalarGridSpec(
            num_scalar_prefetch=0,
            grid=grid,
            in_specs=[
                pl.BlockSpec((G, N, F_in), lambda b: (b, 0, 0)),
                pl.BlockSpec((G, N, N), lambda b: (b, 0, 0)),
                # Constant index_map -> weights stay VMEM-resident across steps.
                pl.BlockSpec((F_in, F_pad + 2), lambda b: (0, 0)),
            ],
            out_specs=pl.BlockSpec((G, N, F_pad), lambda b: (b, 0, 0)),
        ),
        compiler_params=pltpu.CompilerParams(
            dimension_semantics=("parallel",),
            vmem_limit_bytes=48 * 1024 * 1024,
        ),
    )(h, adj_mask, W_ext)

    return out[..., :F_out]


def _xavier_uniform(key, shape, gain):
    fan_out, fan_in = shape[0], shape[1]  # PyTorch: fan_in = size(1), fan_out = size(0)
    bound = gain * math.sqrt(6.0 / (fan_in + fan_out))
    return jax.random.uniform(key, shape, jnp.float32, -bound, bound)


def _reference(h, adj, W, a, alpha, concat):
    """Pure-JAX reference (exact softmax) for correctness checking."""
    F_out = W.shape[1]
    Wh = jnp.einsum("bnf,fo->bno", h, W)
    Wh1 = Wh @ a[:F_out]                      # (B, N, 1)
    Wh2 = Wh @ a[F_out:]                      # (B, N, 1)
    e = Wh1 + jnp.swapaxes(Wh2, 1, 2)         # (B, N, N)
    e = jnp.where(e > 0, e, alpha * e)
    att = jnp.where(adj > 0, e, -9e15)
    att = jax.nn.softmax(att, axis=-1)
    h_prime = jnp.einsum("bnm,bmo->bno", att, Wh)
    return jax.nn.elu(h_prime) if concat else h_prime


if __name__ == "__main__":
    key = jax.random.PRNGKey(0)
    k_h, k_adj, k_w, k_a = jax.random.split(key, 4)

    B, N = 4, 16
    in_features, out_features = 32, 16
    alpha = 0.2

    # Deterministic parameter init (xavier_uniform, gain=1.414) in-script.
    W = _xavier_uniform(k_w, (in_features, out_features), gain=1.414)
    a = _xavier_uniform(k_a, (2 * out_features, 1), gain=1.414)

    # Inputs: node features + random sparse-ish adjacency (with self-loops).
    h = jax.random.normal(k_h, (B, N, in_features), jnp.float32)
    adj = (jax.random.uniform(k_adj, (B, N, N)) > 0.5).astype(jnp.float32)
    adj = jnp.maximum(adj, jnp.eye(N, dtype=jnp.float32)[None])

    # Tolerance covers the EUP approximate reciprocal in the softmax denominator
    # (pl.reciprocal(approx=True)); everything else runs in float32.
    TOL = 5e-3

    for concat in (True, False):
        out = graph_attention_head(h, adj, W, a, alpha=alpha, concat=concat)
        out = jax.block_until_ready(out)
        ref = _reference(h, adj, W, a, alpha, concat)
        assert out.shape == (B, N, out_features)
        assert jnp.allclose(out, ref, atol=TOL, rtol=TOL), \
            f"mismatch vs reference (concat={concat})"

    print("KERNEL_OK")
</pallas_src>

<mosaic_0001>
module attributes {stable_mosaic.version = 11 : i64} {
  func.func @_gat_kernel(%arg0: i32, %arg1: memref<2x16x32xf32, #tpu.memory_space<vmem>>, %arg2: memref<2x16x16xi8, #tpu.memory_space<vmem>>, %arg3: memref<32x130xf32, #tpu.memory_space<vmem>>, %arg4: memref<2x16x128xf32, #tpu.memory_space<vmem>>) attributes {dimension_semantics = [#tpu.dimension_semantics<parallel>], iteration_bounds = array<i64: 2>, scalar_prefetch = 0 : i64, scratch_operands = 0 : i64, tpu.core_type = #tpu.core_type<tc>, window_params = [{transform_indices = @transform_0, window_bounds = array<i64: 2, 16, 32>}, {transform_indices = @transform_1, window_bounds = array<i64: 2, 16, 16>}, {pipeline_mode = #tpu.pipeline_mode<synchronous>, transform_indices = @transform_2, window_bounds = array<i64: 32, 130>}, {transform_indices = @transform_3, window_bounds = array<i64: 2, 16, 128>}]} {
    %c0 = arith.constant 0 : index
    %c0_0 = arith.constant 0 : index
    %c0_1 = arith.constant 0 : index
    %0 = vector.load %arg1[%c0, %c0_0, %c0_1] : memref<2x16x32xf32, #tpu.memory_space<vmem>>, vector<2x16x32xf32>
    %1 = vector.shape_cast %0 : vector<2x16x32xf32> to vector<32x32xf32>
    %c0_2 = arith.constant 0 : index
    %c0_3 = arith.constant 0 : index
    %2 = vector.load %arg3[%c0_2, %c0_3] : memref<32x130xf32, #tpu.memory_space<vmem>>, vector<32x130xf32>
    %cst = arith.constant dense<0.000000e+00> : vector<32x130xf32>
    %3 = tpu.matmul %1, %2, %cst {dimension_numbers = #tpu.dot_dimension_numbers<[1], [0], [0], [1], [0, 0, 1, 1], [], []>} : vector<32x32xf32>, vector<32x130xf32>, vector<32x130xf32> -> vector<32x130xf32>
    %c0_4 = arith.constant 0 : index
    %c0_5 = arith.constant 0 : index
    %c0_6 = arith.constant 0 : index
    %4 = vector.load %arg2[%c0_4, %c0_5, %c0_6] : memref<2x16x16xi8, #tpu.memory_space<vmem>>, vector<2x16x16xi8>
    %5 = arith.sitofp %4 : vector<2x16x16xi8> to vector<2x16x16xf32>
    %6 = vector.extract_strided_slice %3 {offsets = [0, 0], sizes = [16, 128], strides = [1, 1]} : vector<32x130xf32> to vector<16x128xf32>
    %7 = vector.extract_strided_slice %3 {offsets = [0, 128], sizes = [16, 1], strides = [1, 1]} : vector<32x130xf32> to vector<16x1xf32>
    %8 = vector.extract_strided_slice %3 {offsets = [0, 129], sizes = [16, 1], strides = [1, 1]} : vector<32x130xf32> to vector<16x1xf32>
    %9 = tpu.transpose %8, [1, 0] : vector<16x1xf32> -> vector<1x16xf32>
    %10 = vector.broadcast %7 : vector<16x1xf32> to vector<16x16xf32>
    %11 = vector.broadcast %9 : vector<1x16xf32> to vector<16x16xf32>
    %12 = arith.addf %10, %11 : vector<16x16xf32>
    %cst_7 = arith.constant 0.000000e+00 : f32
    %13 = vector.broadcast %cst_7 : f32 to vector<16x16xf32>
    %14 = arith.cmpf ogt, %12, %13 : vector<16x16xf32>
    %cst_8 = arith.constant 2.000000e-01 : f32
    %15 = vector.broadcast %cst_8 : f32 to vector<16x16xf32>
    %16 = arith.mulf %15, %12 : vector<16x16xf32>
    %17 = arith.select %14, %12, %16 : vector<16x16xi1>, vector<16x16xf32>
    %18 = vector.extract_strided_slice %5 {offsets = [0, 0, 0], sizes = [1, 16, 16], strides = [1, 1, 1]} : vector<2x16x16xf32> to vector<1x16x16xf32>
    %19 = vector.shape_cast %18 : vector<1x16x16xf32> to vector<16x16xf32>
    %cst_9 = arith.constant 0.000000e+00 : f32
    %20 = vector.broadcast %cst_9 : f32 to vector<16x16xf32>
    %21 = arith.cmpf ogt, %19, %20 : vector<16x16xf32>
    %cst_10 = arith.constant -9.000000e+15 : f32
    %22 = vector.broadcast %cst_10 : f32 to vector<16x16xf32>
    %23 = arith.select %21, %17, %22 : vector<16x16xi1>, vector<16x16xf32>
    %cst_11 = arith.constant dense<0xFF800000> : vector<16xf32>
    %24 = vector.multi_reduction <maximumf>, %23, %cst_11 [1] : vector<16x16xf32> to vector<16xf32>
    %25 = vector.shape_cast %24 : vector<16xf32> to vector<16x1xf32>
    %26 = vector.broadcast %25 : vector<16x1xf32> to vector<16x16xf32>
    %27 = arith.subf %23, %26 : vector<16x16xf32>
    %28 = math.exp %27 : vector<16x16xf32>
    %cst_12 = arith.constant dense<0.000000e+00> : vector<16xf32>
    %29 = vector.multi_reduction <add>, %28, %cst_12 [1] : vector<16x16xf32> to vector<16xf32>
    %30 = vector.shape_cast %29 : vector<16xf32> to vector<16x1xf32>
    %31 = tpu.reciprocal %30 {approx = true} : vector<16x1xf32> -> vector<16x1xf32>
    %32 = vector.broadcast %31 : vector<16x1xf32> to vector<16x16xf32>
    %33 = arith.mulf %28, %32 : vector<16x16xf32>
    %cst_13 = arith.constant dense<0.000000e+00> : vector<16x128xf32>
    %34 = tpu.matmul %33, %6, %cst_13 {dimension_numbers = #tpu.dot_dimension_numbers<[1], [0], [0], [1], [0, 0, 1, 1], [], []>} : vector<16x16xf32>, vector<16x128xf32>, vector<16x128xf32> -> vector<16x128xf32>
    %cst_14 = arith.constant 0.000000e+00 : f32
    %35 = vector.broadcast %cst_14 : f32 to vector<16x128xf32>
    %36 = arith.cmpf ogt, %34, %35 : vector<16x128xf32>
    %cst_15 = arith.constant 0.000000e+00 : f32
    %37 = vector.broadcast %cst_15 : f32 to vector<16x128xf32>
    %38 = arith.minimumf %34, %37 : vector<16x128xf32>
    %39 = math.exp %38 : vector<16x128xf32>
    %cst_16 = arith.constant 1.000000e+00 : f32
    %40 = vector.broadcast %cst_16 : f32 to vector<16x128xf32>
    %41 = arith.subf %39, %40 : vector<16x128xf32>
    %42 = arith.select %36, %34, %41 : vector<16x128xi1>, vector<16x128xf32>
    %c0_17 = arith.constant 0 : index
    %c0_18 = arith.constant 0 : index
    %c0_19 = arith.constant 0 : index
    %43 = vector.load %arg4[%c0_17, %c0_18, %c0_19] : memref<2x16x128xf32, #tpu.memory_space<vmem>>, vector<1x16x128xf32>
    %44 = vector.shape_cast %43 : vector<1x16x128xf32> to vector<16x128xf32>
    %45 = vector.shape_cast %42 : vector<16x128xf32> to vector<1x16x128xf32>
    tpu.vector_store %arg4[%c0_17, %c0_18, %c0_19], %45 {strides = array<i32>} : memref<2x16x128xf32, #tpu.memory_space<vmem>>, vector<1x16x128xf32>,
    %46 = vector.extract_strided_slice %3 {offsets = [16, 0], sizes = [16, 128], strides = [1, 1]} : vector<32x130xf32> to vector<16x128xf32>
    %47 = vector.extract_strided_slice %3 {offsets = [16, 128], sizes = [16, 1], strides = [1, 1]} : vector<32x130xf32> to vector<16x1xf32>
    %48 = vector.extract_strided_slice %3 {offsets = [16, 129], sizes = [16, 1], strides = [1, 1]} : vector<32x130xf32> to vector<16x1xf32>
    %49 = tpu.transpose %48, [1, 0] : vector<16x1xf32> -> vector<1x16xf32>
    %50 = vector.broadcast %47 : vector<16x1xf32> to vector<16x16xf32>
    %51 = vector.broadcast %49 : vector<1x16xf32> to vector<16x16xf32>
    %52 = arith.addf %50, %51 : vector<16x16xf32>
    %cst_20 = arith.constant 0.000000e+00 : f32
    %53 = vector.broadcast %cst_20 : f32 to vector<16x16xf32>
    %54 = arith.cmpf ogt, %52, %53 : vector<16x16xf32>
    %cst_21 = arith.constant 2.000000e-01 : f32
    %55 = vector.broadcast %cst_21 : f32 to vector<16x16xf32>
    %56 = arith.mulf %55, %52 : vector<16x16xf32>
    %57 = arith.select %54, %52, %56 : vector<16x16xi1>, vector<16x16xf32>
    %58 = vector.extract_strided_slice %5 {offsets = [1, 0, 0], sizes = [1, 16, 16], strides = [1, 1, 1]} : vector<2x16x16xf32> to vector<1x16x16xf32>
    %59 = vector.shape_cast %58 : vector<1x16x16xf32> to vector<16x16xf32>
    %cst_22 = arith.constant 0.000000e+00 : f32
    %60 = vector.broadcast %cst_22 : f32 to vector<16x16xf32>
    %61 = arith.cmpf ogt, %59, %60 : vector<16x16xf32>
    %cst_23 = arith.constant -9.000000e+15 : f32
    %62 = vector.broadcast %cst_23 : f32 to vector<16x16xf32>
    %63 = arith.select %61, %57, %62 : vector<16x16xi1>, vector<16x16xf32>
    %cst_24 = arith.constant dense<0xFF800000> : vector<16xf32>
    %64 = vector.multi_reduction <maximumf>, %63, %cst_24 [1] : vector<16x16xf32> to vector<16xf32>
    %65 = vector.shape_cast %64 : vector<16xf32> to vector<16x1xf32>
    %66 = vector.broadcast %65 : vector<16x1xf32> to vector<16x16xf32>
    %67 = arith.subf %63, %66 : vector<16x16xf32>
    %68 = math.exp %67 : vector<16x16xf32>
    %cst_25 = arith.constant dense<0.000000e+00> : vector<16xf32>
    %69 = vector.multi_reduction <add>, %68, %cst_25 [1] : vector<16x16xf32> to vector<16xf32>
    %70 = vector.shape_cast %69 : vector<16xf32> to vector<16x1xf32>
    %71 = tpu.reciprocal %70 {approx = true} : vector<16x1xf32> -> vector<16x1xf32>
    %72 = vector.broadcast %71 : vector<16x1xf32> to vector<16x16xf32>
    %73 = arith.mulf %68, %72 : vector<16x16xf32>
    %cst_26 = arith.constant dense<0.000000e+00> : vector<16x128xf32>
    %74 = tpu.matmul %73, %46, %cst_26 {dimension_numbers = #tpu.dot_dimension_numbers<[1], [0], [0], [1], [0, 0, 1, 1], [], []>} : vector<16x16xf32>, vector<16x128xf32>, vector<16x128xf32> -> vector<16x128xf32>
    %cst_27 = arith.constant 0.000000e+00 : f32
    %75 = vector.broadcast %cst_27 : f32 to vector<16x128xf32>
    %76 = arith.cmpf ogt, %74, %75 : vector<16x128xf32>
    %cst_28 = arith.constant 0.000000e+00 : f32
    %77 = vector.broadcast %cst_28 : f32 to vector<16x128xf32>
    %78 = arith.minimumf %74, %77 : vector<16x128xf32>
    %79 = math.exp %78 : vector<16x128xf32>
    %cst_29 = arith.constant 1.000000e+00 : f32
    %80 = vector.broadcast %cst_29 : f32 to vector<16x128xf32>
    %81 = arith.subf %79, %80 : vector<16x128xf32>
    %82 = arith.select %76, %74, %81 : vector<16x128xi1>, vector<16x128xf32>
    %c1 = arith.constant 1 : index
    %c0_30 = arith.constant 0 : index
    %c0_31 = arith.constant 0 : index
    %83 = vector.load %arg4[%c1, %c0_30, %c0_31] : memref<2x16x128xf32, #tpu.memory_space<vmem>>, vector<1x16x128xf32>
    %84 = vector.shape_cast %83 : vector<1x16x128xf32> to vector<16x128xf32>
    %85 = vector.shape_cast %82 : vector<16x128xf32> to vector<1x16x128xf32>
    tpu.vector_store %arg4[%c1, %c0_30, %c0_31], %85 {strides = array<i32>} : memref<2x16x128xf32, #tpu.memory_space<vmem>>, vector<1x16x128xf32>,
    return
  }
  func.func @transform_0(%arg0: i32) -> (i32, i32, i32) {
    %c0_i32 = arith.constant 0 : i32
    %c0_i32_0 = arith.constant 0 : i32
    %c0_i32_1 = arith.constant 0 : i32
    return %arg0, %c0_i32, %c0_i32_0 : i32, i32, i32
  }
  func.func @transform_1(%arg0: i32) -> (i32, i32, i32) {
    %c0_i32 = arith.constant 0 : i32
    %c0_i32_0 = arith.constant 0 : i32
    %c0_i32_1 = arith.constant 0 : i32
    return %arg0, %c0_i32, %c0_i32_0 : i32, i32, i32
  }
  func.func @transform_2(%arg0: i32) -> (i32, i32) {
    %c0_i32 = arith.constant 0 : i32
    %c0_i32_0 = arith.constant 0 : i32
    %c0_i32_1 = arith.constant 0 : i32
    return %c0_i32, %c0_i32_0 : i32, i32
  }
  func.func @transform_3(%arg0: i32) -> (i32, i32, i32) {
    %c0_i32 = arith.constant 0 : i32
    %c0_i32_0 = arith.constant 0 : i32
    %c0_i32_1 = arith.constant 0 : i32
    return %arg0, %c0_i32, %c0_i32_0 : i32, i32, i32
  }
}

</mosaic_0001>

<bundles_post_ra>
// kernel: tpu_custom_call.1
= control target key start
LH: loop header
LB: loop body
LE: loop exit
PB: predicated region body
PF: predicated region fallthrough
CT: control target
= control target key end

     0   :  { %s1525_s0 = inlined_call_operand.hbm [shape: f32[4,16,32], index: 0, kind: input, shape index: {}]   ;;  %s1526_s1 = inlined_call_operand.hbm [shape: s8[4,16,16], index: 1, kind: input, shape index: {}]   ;;  %s1527_s2 = inlined_call_operand.hbm [shape: f32[32,130], index: 2, kind: input, shape index: {}]   ;;  %s1528_s3 = inlined_call_operand.hbm [shape: f32[4,16,128], index: 3, kind: output, shape index: {}]  }
   0x1   :  { %1532 = sst [smem:[#allocation13_spill]] %s1525_s0 }
   0x2   :  { %8 = vsyncpa [#allocation3], 0 }
   0x3   :  { %10 = vsyncpa [#allocation3 + $0x1], 0 }
   0x4   :  { %11 = vsyncpa [#allocation6], 0 }
   0x5   :  { %13 = vsyncpa [#allocation6 + $0x1], 0 }
   0x6   :  { %14 = vsyncpa [#allocation4], 0 }
   0x7   :  { %16 = vsyncpa [#allocation4 + $0x1], 0  ;;  %s1250_s12 = smov 0   ;;  %s1252_s13 = smov 0  }
   0x8   :  { %s1254_s14 = smov 0   ;;  %s1256_s15 = smov 0  }
   0x9 LB: > { %s1271_s16 = sadd.s32 4294967295, %s1213_s15   ;;  %s858_s17 = sadd.s32 4294967294, %s1213_s15   ;;  %s1213_s15 = sphi %s1256_s15, %s1550_s15   ;;  %s1209_s14 = sphi %s1254_s14, %s1549_s14   ;;  %s1205_s13 = sphi %s1252_s13, %s1548_s13   ;;  %s1201_s12 = sphi %s1250_s12, %s1547_s12  }
   0xa   : > { %p42_p0 = scmp.ne.s32.totalorder %s1205_s13, %s1201_s12  ;;  %p1529_p1 = scmp.eq.s32.totalorder %s1271_s16, 0 }
   0xb   : > { %p119_p3 = scmp.eq.s32.totalorder %s858_s17, 1  ;;  %p859_p5 = scmp.ge.s32.totalorder %s1213_s15, 1 }
   0xc   : > { %p1280_p4 = por %p1529_p1, %p42_p0  ;;  %p126_p7 = scmp.lt.s32.totalorder %s1213_s15, 3 }
   0xd   : > { %p1285_p6 = por %p119_p3, %p42_p0  ;;  %s1215_s21 = smov [#allocation7]  }
   0xe   : > { %s1533_s18 = scalar_select %p1280_p4, 1, 0 }
   0xf   : > { %s1534_s19 = scalar_select %p1285_p6, 1, 0 }
  0x10   : > { %p1290_p8 = pnand %p859_p5, %p126_p7  ;;  %s138_s22 = sshll.u32 %s1215_s21, 4  ;;  %s1294_s22 = int_to_ptr.vmem [resolvable:$true] %s138_s22 }
  0x11   : > { %s1306_s24 = sadd.s32 1, %s1213_s15   ;;  %s29_s25 = sadd.s32 1, %s1209_s14 }
  0x12   : > { %s1535_s20 = scalar_select %p1290_p8, 1, 0 }
  0x13   : > { %p962_p9 = pneg %p1290_p8  ;;  %s26_s26 = ssub.s32 %s1213_s15, %s1306_s24 }
  0x14   : > { %s1051_s29 = scalar_lea.hbm %s1527_s2, 1024 }
  0x15   : > { %p1301_p11 = pnand %p962_p9, %p1529_p1  ;;  %p1052_p12 = scmp.ne.s32.totalorder %s1527_s2, %s1051_s29 }
  0x16   : > { %p1058_p5 = scmp.lt.u32.totalorder %s1051_s29, %s1527_s2 }
  0x17   : > { %p1053_p13 = pneg %p1301_p11 }
  0x19   : > { %p1054_p0 = pnand %p1053_p13, %p1052_p12 }
  0x1b   : > { %p1055_p3 = pneg %p1054_p0 }
  0x1d   : > { %p1060_p7 = pnand %p1058_p5, %p1055_p3 }
  0x1f   : > { %1063 = shalt.err (!%p1060_p7)
}
  0x20   : > { %s1064_s7 = scalar_lea.vmem %s1294_s22, 1024  ;;  %p1072_p2 = scmp.lt.s32.totalorder %s1294_s22, %s1294_s22 }
  0x21   : > { %p1065_p9 = scmp.ne.s32.totalorder %s1294_s22, %s1064_s7  ;;  %p1073_p6 = scmp.lt.s32.totalorder %s1064_s7, %s1064_s7 }
  0x23   : > { %p1067_p10 = pnand %p1065_p9, %p1053_p13  ;;  %p1074_p4 = por %p1073_p6, %p1072_p2 }
  0x25   : > { %p1068_p1 = pneg %p1067_p10 }
  0x27   : > { %p1075_p8 = pnand %p1074_p4, %p1068_p1 }
  0x29   : > { %1078 = shalt.err (!%p1075_p8)
}
  0x2a   : > { %s1216_s8 = smov 256   ;;  %s1217_s9 = smov 16  }
  0x2b   : > { %965 = dma.hbm_to_vmem [thread:$0]  (!%p1301_p11), %s1527_s2, 1024, %s1294_s22, [#allocation6], %s1216_s8, %s1216_s8, %s1217_s9  }
  0x2c   : > { %p27_p2 = scmp.eq.s32.totalorder %s26_s26, 0  ;;  %p36_p1 = scmp.ne.s32.totalorder %s1209_s14, %s1205_s13 }
  0x2d   : > { %p37_p4 = scmp.eq.s32.totalorder %s1213_s15, 0  ;;  %p978_p6 = scmp.lt.s32.totalorder %s1213_s15, 2 }
  0x2e   : > { %s1337_s17 = scalar_select %p27_p2, %s1209_s14, %s29_s25  }
  0x2f   : > { %p38_p8 = por %p37_p4, %p36_p1  ;;  %p1537_p10 = scmp.eq.s32.totalorder %s1271_s16, 1 }
  0x30   : > { %s1346_s27 = sand.u32 1, %s1209_s14   ;;  %s896_s23 = sshll.u32 %s1213_s15, 9 }
  0x31   : > { %p1341_p12 = por %p1537_p10, %p36_p1  ;;  %s862_s28 = sshll.u32 %s1346_s27, 5 }
  0x32   : > { %s1539_s0 = sld [smem:[#allocation13_spill]]  ;;  %s156_s25 = scalar_lea.vmem [#allocation2], %s862_s28 }
  0x33   : > { %s164_s30 = sshll.u32 %s156_s25, 4  ;;  %p1355_p11 = pnand %p978_p6, %p38_p8  ;;  %s1359_s30 = int_to_ptr.vmem [resolvable:$true] %s164_s30 }
  0x34   : > { %s153_s5 = scalar_lea.sflag [#allocation3], %s1346_s27 }
  0x35   : > { %p1081_p0 = pneg %p1355_p11 }
  0x38   : > { %s1353_s26 = scalar_lea.hbm %s1539_s0, %s896_s23  ;;  %s1084_s9 = scalar_lea.hbm %s1539_s0, 1024 }
  0x39   : > { %s1079_s6 = scalar_lea.hbm %s1353_s26, 512  ;;  %p1085_p7 = scmp.lt.u32.totalorder %s1353_s26, %s1539_s0 }
  0x3a   : > { %p1080_p13 = scmp.ne.s32.totalorder %s1353_s26, %s1079_s6  ;;  %p1086_p9 = scmp.lt.u32.totalorder %s1084_s9, %s1079_s6 }
  0x3b   : > { %p1088_p1 = scmp.lt.u32.totalorder %s1079_s6, %s1353_s26 }
  0x3c   : > { %p1082_p3 = pnand %p1081_p0, %p1080_p13  ;;  %p1087_p2 = por %p1086_p9, %p1085_p7 }
  0x3e   : > { %p1083_p5 = pneg %p1082_p3  ;;  %p1089_p4 = por %p1088_p1, %p1087_p2 }
  0x40   : > { %p1090_p6 = pnand %p1089_p4, %p1083_p5 }
  0x42   : > { %1093 = shalt.err (!%p1090_p6)
}
  0x43   : > { %s1094_s23 = scalar_lea.vmem %s1359_s30, 512  ;;  %s1218_s28 = smov [#allocation2]  }
  0x44   : > { %p1095_p8 = scmp.ne.s32.totalorder %s1359_s30, %s1094_s23  ;;  %s1099_s29 = sshll.u32 %s1218_s28, 4  ;;  %s1100_s29 = int_to_ptr.vmem [resolvable:$false] %s1099_s29 }
  0x45   : > { %s1101_s22 = scalar_lea.vmem %s1100_s29, 1024  ;;  %p1102_p3 = scmp.lt.s32.totalorder %s1359_s30, %s1100_s29 }
  0x46   : > { %p1097_p10 = pnand %p1095_p8, %p1081_p0  ;;  %p1103_p7 = scmp.lt.s32.totalorder %s1101_s22, %s1094_s23 }
  0x48   : > { %p1098_p13 = pneg %p1097_p10  ;;  %p1104_p9 = por %p1103_p7, %p1102_p3 }
  0x4a   : > { %p1105_p2 = pnand %p1104_p9, %p1098_p13 }
  0x4c   : > { %1108 = shalt.err (!%p1105_p2)
}
  0x4d   : > { %s1219_s25 = smov 128   ;;  %s1220_s6 = smov 8  }
  0x4e   : > { %969 = dma.hbm_to_vmem [thread:$0]  (!%p1355_p11), %s1353_s26, 512, %s1359_s30, %s153_s5, %s1219_s25, %s1219_s25, %s1220_s6  }
  0x4f   : > { %s174_s7 = sand.u32 1, %s1213_s15   ;;  %s866_s8 = sshll.u32 %s1346_s27, 3 }
  0x50   : > { %s898_s9 = sshll.u32 %s1213_s15, 7  ;;  %s178_s10 = scalar_lea.vmem [#allocation5], %s866_s8 }
  0x51   : > { %s186_s11 = sshll.u32 %s178_s10, 4  ;;  %s1395_s29 = scalar_lea.hbm %s1526_s1, %s898_s9  ;;  %s1397_s11 = int_to_ptr.vmem [resolvable:$true] %s186_s11 }
  0x52   : > { %s1399_s22 = scalar_lea.sflag [#allocation6], %s174_s7  ;;  %s1109_s0 = scalar_lea.hbm %s1395_s29, 128 }
  0x53   : > { %p1110_p5 = scmp.ne.s32.totalorder %s1395_s29, %s1109_s0  ;;  %s1114_s30 = scalar_lea.hbm %s1526_s1, 256 }
  0x54   : > { %p1115_p6 = scmp.lt.u32.totalorder %s1395_s29, %s1526_s1  ;;  %p1116_p8 = scmp.lt.u32.totalorder %s1114_s30, %s1109_s0 }
  0x55   : > { %p1112_p1 = pnand %p1110_p5, %p1081_p0  ;;  %p1118_p13 = scmp.lt.u32.totalorder %s1109_s0, %s1395_s29 }
  0x56   : > { %p1117_p10 = por %p1116_p8, %p1115_p6 }
  0x57   : > { %p1113_p4 = pneg %p1112_p1 }
  0x58   : > { %p1119_p3 = por %p1118_p13, %p1117_p10 }
  0x5a   : > { %p1120_p7 = pnand %p1119_p3, %p1113_p4 }
  0x5c   : > { %1123 = shalt.err (!%p1120_p7)
}
  0x5d   : > { %s1124_s6 = scalar_lea.vmem %s1397_s11, 128  ;;  %s1221_s7 = smov [#allocation5]  }
  0x5e   : > { %p1125_p9 = scmp.ne.s32.totalorder %s1397_s11, %s1124_s6  ;;  %s1129_s8 = sshll.u32 %s1221_s7, 4  ;;  %s1130_s8 = int_to_ptr.vmem [resolvable:$false] %s1129_s8 }
  0x5f   : > { %s1131_s9 = scalar_lea.vmem %s1130_s8, 256  ;;  %p1132_p1 = scmp.lt.s32.totalorder %s1397_s11, %s1130_s8 }
  0x60   : > { %p1127_p2 = pnand %p1125_p9, %p1081_p0  ;;  %p1133_p6 = scmp.lt.s32.totalorder %s1131_s9, %s1124_s6 }
  0x62   : > { %p1128_p5 = pneg %p1127_p2  ;;  %p1134_p8 = por %p1133_p6, %p1132_p1 }
  0x64   : > { %p1135_p10 = pnand %p1134_p8, %p1128_p5 }
  0x66   : > { %1138 = shalt.err (!%p1135_p10)
}
  0x67   : > { %s1222_s0 = smov 32   ;;  %s1223_s10 = smov 2  }
  0x68   : > { %972 = dma.hbm_to_vmem [thread:$0]  (!%p1355_p11), %s1395_s29, 128, %s1397_s11, %s1399_s22, %s1222_s0, %s1222_s0, %s1223_s10  }
  0x69   : > { %p1541_p0 = scmp.ne.s32.totalorder %s1535_s20, 0 }
  0x6a   : > { %s1428_s23 = sand.u32 (!%p1541_p0), 1, %s1205_s13   ;;  %p1542_p4 = scmp.ne.s32.totalorder (!%p1541_p0), %s1533_s18, 0 }
  0x6b   : > { %198 = sbr.rel (%p1541_p0) target bundleno = 1167 (0x48f), region = 32  ;;  %s871_s28 = sshll.u32 (!%p1541_p0), %s1428_s23, 5 }
  0x6c   : > { %s201_s27 = scalar_lea.sflag (!%p1541_p0), [#allocation3], %s1428_s23  ;;  %s1434_s26 = scalar_lea.vmem (!%p1541_p0), [#allocation2], %s871_s28 }
  0x72   : > { %1184 = dma.done.wait (%p1542_p4), %s201_s27, 512  }
  0x73   : > { %1186 = vsyncadd (%p1542_p4), %s201_s27, 4294966784  ;;  %s209_s20 = sand.u32 1, %s1271_s16   ;;  %s872_s4 = sshll.u32 %s1428_s23, 3 }
  0x74   : > { %s210_s11 = scalar_lea.sflag [#allocation6], %s209_s20  ;;  %s1442_s29 = scalar_lea.vmem [#allocation5], %s872_s4 }
  0x75   : > { %1188 = dma.done.wait (%p1542_p4), %s210_s11, 128  }
  0x76   : > { %1190 = vsyncadd (%p1542_p4), %s210_s11, 4294967168  ;;  %p1543_p11 = scmp.eq.s32.totalorder %s1271_s16, 0 }
  0x78   : > { %1192 = dma.done.wait (%p1543_p11), [#allocation6], 1024   ;;  %p1544_p13 = pmov %p1543_p11 }
  0x79   : > { %v1224_v0 = vmov 0.0   ;;  %v253_v1 = vld [vmem:[#allocation7 + $0x8] sm:$0xff]  ;;  %v255_v2 = vld [vmem:[#allocation7 + $0x18] sm:$0xff]  ;;  %v252_v3 = vld [vmem:[#allocation7] sm:$0xff]  ;;  %vm260_vm0 = vcmask 261120   ;;  %v1225_v17 = vmov 0   ;;  %v422_v32 = vlaneseq }
  0x7a   : > { %1194 = vsyncadd (%p1544_p13), [#allocation6], 4294966272  ;;  %337 = vmatprep.mubr.f32.mxu0 %v1224_v0  ;;  %355 = vmatprep.mubr.f32.mxu1 %v1224_v0  ;;  %v931_v4 = vpack.c.bf16 %v255_v2, %v253_v1  ;;  %v254_v5 = vld [vmem:[#allocation7 + $0x10] sm:$0xff]  ;;  %v257_v6 = vld [vmem:[#allocation7 + $0x28] sm:$0xff]  ;;  %s1226_s18 = smov 127   ;;  %vm438_vm5 = vcmask 130048  }
  0x7b   : > { %v259_v7 = vld [vmem:[#allocation7 + $0x38] sm:$0xff]  ;;  %v933_v8 = vpack.c.bf16 %v254_v5, %v252_v3  ;;  %v256_v10 = vld [vmem:[#allocation7 + $0x20] sm:$0xff]  ;;  %v258_v11 = vld [vmem:[#allocation7 + $0x30] sm:$0xff]  ;;  %1025 = vset.pattern.permute.xlu0 %v1225_v17  ;;  %1026 = vset.pattern.permute.xlu1 %v1225_v17  ;;  %v423_v34 = vshrl.u32 %v422_v32, 7  ;;  %s244_s22 = scalar_lea.vmem [#allocation8], %s871_s28  ;;  %s900_s5 = sshll.u32 %s1271_s16, 9 }
  0x7c   : > { %v935_v9 = vpack.c.bf16 %v259_v7, %v257_v6  ;;  %932 = vmatprep.subr.bf16.mxu0 %v931_v4  ;;  %947 = vmatprep.subr.bf16.mxu1 %v931_v4  ;;  %v937_v12 = vpack.c.bf16 %v258_v11, %v256_v10  ;;  %v248_v13 = vld [vmem:[%s1434_s26] sm:$0xff]  ;;  %v251_v14 = vld [vmem:[%s1434_s26 + $0x18] sm:$0xff]  ;;  %v249_v15 = vld [vmem:[%s1434_s26 + $0x8] sm:$0xff]  ;;  %s753_s30 = sshll.u32 %s244_s22, 4  ;;  %s1481_s7 = scalar_lea.hbm %s1528_s3, %s900_s5  ;;  %s1476_s30 = int_to_ptr.vmem [resolvable:$true] %s753_s30 }
  0x7d   : > { %934 = vmatpush1.bf16.msra.mxu0 %v933_v8  ;;  %949 = vmatpush1.bf16.msra.mxu1 %v933_v8  ;;  %v250_v16 = vld [vmem:[%s1434_s26 + $0x10] sm:$0xff]  ;;  %v902_v35 = vld [vmem:[%s1442_s29] sm:$0xff]   ;;  %v424_v39 = vsub.s32 0, %v423_v34  ;;  %s739_s16 = scalar_lea.sflag [#allocation4], %s1428_s23  ;;  %s1139_s8 = scalar_lea.vmem %s1476_s30, 512 }
  0x7e   : > { %936 = vmatprep.subr.bf16.mxu0 %v935_v9  ;;  %948 = vmatprep.subr.bf16.mxu1 %v935_v9  ;;  %v904_v37 = vunpack.c.1.s8 %v902_v35  ;;  %v903_v38 = vunpack.c.0.s8 %v902_v35  ;;  %v908_v48 = vunpack.c.3.s8 %v902_v35  ;;  %v907_v49 = vunpack.c.2.s8 %v902_v35  ;;  %p1140_p3 = scmp.ne.s32.totalorder %s1476_s30, %s1139_s8  ;;  %s1227_s9 = smov [#allocation8]  }
  0x7f   : > { %s1143_s0 = sshll.u32 %s1227_s9, 4  ;;  %s1144_s0 = int_to_ptr.vmem [resolvable:$false] %s1143_s0 }
  0x80   : > { %v371_v42 = vcvt.s32.f32 %v904_v37  ;;  %v370_v43 = vcvt.s32.f32 %v903_v38  ;;  %v373_v57 = vcvt.s32.f32 %v908_v48  ;;  %v372_v58 = vcvt.s32.f32 %v907_v49  ;;  %p1141_p7 = pnand %p1140_p3, %p1341_p12  ;;  %s1145_s10 = scalar_lea.vmem %s1144_s0, 1024 }
  0x81   : > { %938 = vmatpush1.bf16.msra.mxu0 %v937_v12  ;;  %950 = vmatpush1.bf16.msra.mxu1 %v937_v12  ;;  %p1146_p2 = scmp.lt.s32.totalorder %s1476_s30, %s1144_s0  ;;  %p1147_p5 = scmp.lt.s32.totalorder %s1145_s10, %s1139_s8 }
  0x82   : > { %vm435_vm1 = vcmp.gt.f32.partialorder %v371_v42, 0.0  ;;  %vm434_vm2 = vcmp.gt.f32.partialorder %v370_v43, 0.0  ;;  %vm617_vm6 = vcmp.gt.f32.partialorder %v373_v57, 0.0  ;;  %vm616_vm7 = vcmp.gt.f32.partialorder %v372_v58, 0.0  ;;  %p1142_p9 = pneg %p1141_p7 }
  0x83   : > { %p1148_p1 = por %p1147_p5, %p1146_p2 }
  0x84   : > { %875 = vmatmul.mubr.msk.f32.vlgmr.msra.gmra.mrb[0].mxu0 %vm260_vm0, %v248_v13  ;;  %878 = vmatmul.mubr.msk.f32.vlgmr.msra.gmra.mrb[0].mxu1 %vm260_vm0, %v251_v14 }
  0x85   : > { %343 = vmatprep.mubr.f32.mxu0 %v1224_v0  ;;  %p1149_p6 = pnand %p1148_p1, %p1142_p9 }
  0x88   : > { %876 = vmatmul.mubr.msk.f32.gmra.mrb[2].mxu0 %vm260_vm0, %v249_v15 }
  0x89   : > { %349 = vmatprep.mubr.f32.mxu0 %v1224_v0 }
  0x8c   : > { %877 = vmatmul.mubr.msk.f32.gmra.mrb[4].mxu0 %vm260_vm0, %v250_v16 }
 0x157   : > { %v339_v18 = vpop.f32.mrb[0].mxu0  ;;  %v357_v19 = vpop.f32.mrb[0].mxu1 }
 0x158   : > { %v341_v20 = vpop.f32.mrb[1].mxu0  ;;  %v359_v21 = vpop.f32.mrb[1].mxu1 }
 0x159   : > { %376 = vrot.lane.b32.xlu0 %v341_v20, %s1226_s18 }
 0x15b   : > { %v345_v22 = vpop.f32.mrb[2].mxu0 }
 0x15c   : > { %v939_v23 = vpack.c.bf16 %v345_v22, %v339_v18  ;;  %v347_v24 = vpop.f32.mrb[3].mxu0 }
 0x15d   : > { %378 = vrot.lane.b32.xlu0 %v347_v24, %s1226_s18 }
 0x15e   : > { %940 = vmatprep.subr.bf16.mxu1 %v939_v23 }
 0x15f   : > { %v351_v25 = vpop.f32.mrb[4].mxu0  ;;  %942 = vmatpush3.bf16.msra.mxu1 %v939_v23 }
 0x160   : > { %v1456_v26 = vpack.c.bf16 %v357_v19, %v351_v25  ;;  %v353_v27 = vpop.f32.mrb[5].mxu0 }
 0x161   : > { %415 = vperm.xlu0 %1025, %v341_v20   ;;  %558 = vrot.lane.b32.xlu1 %v353_v27, %s1226_s18 }
 0x162   : > { %944 = vmatprep.subr.bf16.mxu1 %v1456_v26 }
 0x165   : > { %601 = vperm.xlu0 %1025, %v359_v21   ;;  %560 = vrot.lane.b32.xlu1 %v359_v21, %s1226_s18 }
 0x169   : > { %419 = vperm.xlu1 %1026, %v347_v24  }
 0x16d   : > { %597 = vperm.xlu1 %1026, %v353_v27  }
 0x1cb   : > { %v377_v28 = vpop.permute.xlu0 %376 }
 0x1cc   : > { %382 = vxpose.xlu1.b32.start [1/2] (short) (narrow) %v377_v28, 8 }
 0x1cf   : > { %v379_v29 = vpop.permute.xlu0 %378 }
 0x1d0   : > { %383 = vxpose.xlu1.b32.end [2/2] (short) (narrow) %v379_v29, 8 }
 0x1d3   : > { %v559_v30 = vpop.permute.xlu1 %558 }
 0x1d4   : > { %564 = vxpose.xlu0.b32.start [1/2] (short) (narrow) %v559_v30, 8 }
 0x1d7   : > { %v561_v31 = vpop.permute.xlu1 %560 }
 0x1d8   : > { %565 = vxpose.xlu0.b32.end [2/2] (short) (narrow) %v561_v31, 8 }
 0x1e0   : > { %v416_v40 = vpop.permute.xlu0 %415 }
 0x1e4   : > { %v602_v47 = vpop.permute.xlu0 %601 }
 0x1e8   : > { %v420_v33 = vpop.permute.xlu1 %419 }
 0x1ec   : > { %v598_v36 = vpop.permute.xlu1 %597 }
 0x24c   : > { %v398_v41 = vpop.trf.xlu1 }
 0x24d   : > { %v425_v44 = vrot.slane %v398_v41, %v424_v39 }
 0x24f   : > { %v426_v45 = vadd.f32 %v425_v44, %v416_v40  ;;  %v427_v46 = vadd.f32 %v425_v44, %v420_v33 }
 0x251   : > { %vm429_vm3 = vcmp.gt.f32.partialorder %v427_v46, 0.0  ;;  %v431_v50 = vmul.f32 0.2, %v427_v46  ;;  %vm428_vm4 = vcmp.gt.f32.partialorder %v426_v45, 0.0  ;;  %v430_v51 = vmul.f32 0.2, %v426_v45 }
 0x253   : > { %v433_v52 = vsel %vm429_vm3, %v427_v46, %v431_v50  ;;  %v432_v53 = vsel %vm428_vm4, %v426_v45, %v430_v51 }
 0x254   : > { %v580_v54 = vpop.trf.xlu0  ;;  %v437_v55 = vsel %vm435_vm1, %v433_v52, -9e+15  ;;  %v436_v56 = vsel %vm434_vm2, %v432_v53, -9e+15 }
 0x255   : > { %v607_v59 = vrot.slane %v580_v54, %v424_v39  ;;  %v442_v60 = vsel %vm438_vm5, %v437_v55, -inf  ;;  %v439_v61 = vsel %vm438_vm5, %v436_v56, -inf }
 0x256   : > { %443 = vmax.xlane.f32.xlu1 %v442_v60  ;;  %440 = vmax.xlane.f32.xlu0 %v439_v61 }
 0x257   : > { %v608_v62 = vadd.f32 %v607_v59, %v598_v36  ;;  %v609_v63 = vadd.f32 %v607_v59, %v602_v47 }
 0x259   : > { %vm611_vm8 = vcmp.gt.f32.partialorder %v609_v63, 0.0  ;;  %v613_v0 = vmul.f32 0.2, %v609_v63  ;;  %vm610_vm9 = vcmp.gt.f32.partialorder %v608_v62, 0.0  ;;  %v612_v1 = vmul.f32 0.2, %v608_v62 }
 0x25b   : > { %v615_v2 = vsel %vm611_vm8, %v609_v63, %v613_v0  ;;  %v614_v3 = vsel %vm610_vm9, %v608_v62, %v612_v1 }
 0x25c   : > { %v619_v4 = vsel %vm617_vm6, %v615_v2, -9e+15  ;;  %v618_v5 = vsel %vm616_vm7, %v614_v3, -9e+15 }
 0x25d   : > { %v623_v6 = vsel %vm438_vm5, %v619_v4, -inf  ;;  %v620_v7 = vsel %vm438_vm5, %v618_v5, -inf }
 0x25e   : > { %624 = vmax.xlane.f32.xlu1 %v623_v6  ;;  %621 = vmax.xlane.f32.xlu0 %v620_v7 }
 0x2e3   : > { %v444_v8 = vpop.xlane.xlu1 %443  ;;  %v441_v9 = vpop.xlane.xlu0 %440 }
 0x2e4   : > { %v446_v10 = vsub.f32 %v437_v55, %v444_v8  ;;  %v445_v11 = vsub.f32 %v436_v56, %v441_v9 }
 0x2e6   : > { %v449_v12 = vmul.f32 1.442695, %v446_v10  ;;  %v447_v13 = vmul.f32 1.442695, %v445_v11 }
 0x2e8   : > { %1027 = vpow2.f32 %v449_v12 }
 0x2e9   : > { %1029 = vpow2.f32 %v447_v13 }
 0x2eb   : > { %v625_v14 = vpop.xlane.xlu1 %624  ;;  %v622_v15 = vpop.xlane.xlu0 %621 }
 0x2ec   : > { %v627_v16 = vsub.f32 %v619_v4, %v625_v14  ;;  %v626_v17 = vsub.f32 %v618_v5, %v622_v15 }
 0x2ee   : > { %v630_v18 = vmul.f32 1.442695, %v627_v16  ;;  %v628_v19 = vmul.f32 1.442695, %v626_v17 }
 0x2f0   : > { %1031 = vpow2.f32 %v630_v18 }
 0x2f1   : > { %1033 = vpow2.f32 %v628_v19 }
 0x2f2   : > { %v1028_v20 = vpop.eup %1027 }
 0x2f3   : > { %v1030_v21 = vpop.eup %1029  ;;  %v454_v22 = vsel %vm438_vm5, %v1028_v20, 0.0 }
 0x2f4   : > { %455 = vadd.xlane.f32.xlu1 %v454_v22  ;;  %v451_v23 = vsel %vm438_vm5, %v1030_v21, 0.0 }
 0x2f5   : > { %452 = vadd.xlane.f32.xlu0 %v451_v23 }
 0x2fa   : > { %v1032_v24 = vpop.eup %1031 }
 0x2fb   : > { %v1034_v25 = vpop.eup %1033  ;;  %v635_v27 = vsel %vm438_vm5, %v1032_v24, 0.0 }
 0x2fc   : > { %636 = vadd.xlane.f32.xlu1 %v635_v27  ;;  %v632_v28 = vsel %vm438_vm5, %v1034_v25, 0.0 }
 0x2fd   : > { %633 = vadd.xlane.f32.xlu0 %v632_v28 }
 0x381   : > { %v456_v29 = vpop.xlane.xlu1 %455 }
 0x382   : > { %1035 = vrcp.f32 %v456_v29  ;;  %v453_v30 = vpop.xlane.xlu0 %452 }
 0x383   : > { %1037 = vrcp.f32 %v453_v30 }
 0x389   : > { %v637_v31 = vpop.xlane.xlu1 %636 }
 0x38a   : > { %1039 = vrcp.f32 %v637_v31  ;;  %v634_v32 = vpop.xlane.xlu0 %633 }
 0x38b   : > { %1041 = vrcp.f32 %v634_v32 }
 0x38c   : > { %v1036_v33 = vpop.eup %1035 }
 0x38d   : > { %v1038_v34 = vpop.eup %1037  ;;  %v460_v35 = vmul.f32 %v1036_v33, %v1028_v20 }
 0x38e   : > { %v459_v36 = vmul.f32 %v1038_v34, %v1030_v21 }
 0x390   : > { %921 = vmatprep.mubr.msk.f32.mxu1 %vm438_vm5, %v459_v36 }
 0x391   : > { %922 = vmatmul.mubr.msk.f32.vlgmr.msra.gmra.mrb[2].mxu1 %vm438_vm5, %v460_v35 }
 0x392   : > { %946 = vmatpush3.bf16.msra.mxu1 %v1456_v26 }
 0x394   : > { %v1040_v37 = vpop.eup %1039 }
 0x395   : > { %v1042_v38 = vpop.eup %1041  ;;  %v641_v39 = vmul.f32 %v1040_v37, %v1032_v24 }
 0x396   : > { %v640_v40 = vmul.f32 %v1042_v38, %v1034_v25 }
 0x398   : > { %928 = vmatprep.mubr.msk.f32.mxu1 %vm438_vm5, %v640_v40 }
 0x399   : > { %929 = vmatmul.mubr.msk.f32.vlgmr.msra.gmra.mrb[4].mxu1 %vm438_vm5, %v641_v39 }
 0x464   : > { %v923_v41 = vpop.f32.mrb[2].mxu1 }
 0x465   : > { %v545_v42 = vmin.f32 %v923_v41, 0.0  ;;  %v533_v43 = vpop.f32.mrb[3].mxu1  ;;  %vm543_vm10 = vcmp.gt.f32.partialorder %v923_v41, 0.0 }
 0x466   : > { %v544_v44 = vmin.f32 %v533_v43, 0.0  ;;  %vm542_vm11 = vcmp.gt.f32.partialorder %v533_v43, 0.0 }
 0x467   : > { %v548_v45 = vmul.f32 1.442695, %v545_v42 }
 0x468   : > { %v546_v46 = vmul.f32 1.442695, %v544_v44 }
 0x469   : > { %1043 = vpow2.f32 %v548_v45 }
 0x46a   : > { %1045 = vpow2.f32 %v546_v46 }
 0x46c   : > { %v930_v47 = vpop.f32.mrb[4].mxu1 }
 0x46d   : > { %v726_v48 = vmin.f32 %v930_v47, 0.0  ;;  %v714_v26 = vpop.f32.mrb[5].mxu1  ;;  %vm724_vm12 = vcmp.gt.f32.partialorder %v930_v47, 0.0 }
 0x46e   : > { %v725_v49 = vmin.f32 %v714_v26, 0.0  ;;  %vm723_vm13 = vcmp.gt.f32.partialorder %v714_v26, 0.0 }
 0x46f   : > { %v729_v50 = vmul.f32 1.442695, %v726_v48 }
 0x470   : > { %v727_v51 = vmul.f32 1.442695, %v725_v49 }
 0x471   : > { %1047 = vpow2.f32 %v729_v50 }
 0x472   : > { %1049 = vpow2.f32 %v727_v51 }
 0x473   : > { %v1044_v52 = vpop.eup %1043 }
 0x474   : > { %v1046_v53 = vpop.eup %1045  ;;  %v882_v54 = vadd.f32 -1.0, %v1044_v52 }
 0x475   : > { %v881_v55 = vadd.f32 -1.0, %v1046_v53 }
 0x476   : > { %v553_v56 = vsel %vm543_vm10, %v923_v41, %v882_v54 }
 0x477   : > { %555 = vst [vmem:[%s244_s22 + $0x8] sm:$0xff] %v553_v56  ;;  %v552_v57 = vsel %vm542_vm11, %v533_v43, %v881_v55 }
 0x478   : > { %554 = vst [vmem:[%s244_s22] sm:$0xff] %v552_v57 }
 0x47b   : > { %v1048_v58 = vpop.eup %1047 }
 0x47c   : > { %v1050_v59 = vpop.eup %1049  ;;  %v886_v60 = vadd.f32 -1.0, %v1048_v58 }
 0x47d   : > { %v885_v61 = vadd.f32 -1.0, %v1050_v59 }
 0x47e   : > { %v734_v62 = vsel %vm724_vm12, %v930_v47, %v886_v60 }
 0x47f   : > { %888 = vst [vmem:[%s244_s22 + $0x18] sm:$0xff] %v734_v62  ;;  %v733_v63 = vsel %vm723_vm13, %v714_v26, %v885_v61 }
 0x480   : > { %887 = vst [vmem:[%s244_s22 + $0x10] sm:$0xff] %v733_v63 }
 0x481   : > { %1152 = shalt.err (!%p1149_p6)
}
 0x482   : > { %s1153_s28 = scalar_lea.hbm %s1481_s7, 512  ;;  %s1157_s20 = scalar_lea.hbm %s1528_s3, 1024 }
 0x483   : > { %p1154_p8 = scmp.ne.s32.totalorder %s1481_s7, %s1153_s28  ;;  %p1158_p4 = scmp.lt.u32.totalorder %s1481_s7, %s1528_s3 }
 0x484   : > { %p1159_p11 = scmp.lt.u32.totalorder %s1157_s20, %s1153_s28  ;;  %p1161_p3 = scmp.lt.u32.totalorder %s1153_s28, %s1481_s7 }
 0x485   : > { %p1155_p10 = pnand %p1154_p8, %p1341_p12 }
 0x486   : > { %p1160_p13 = por %p1159_p11, %p1158_p4 }
 0x487   : > { %p1156_p0 = pneg %p1155_p10 }
 0x488   : > { %p1162_p7 = por %p1161_p3, %p1160_p13 }
 0x48a   : > { %p1163_p9 = pnand %p1162_p7, %p1156_p0 }
 0x48c   : > { %1166 = shalt.err (!%p1163_p9)
}
 0x48d   : > { %s1228_s29 = smov 128   ;;  %s1229_s18 = smov 8  }
 0x48e   : > { %960 = dma.vmem_to_hbm [thread:$0]  (%p1341_p12), %s1476_s30, 512, %s1481_s7, %s739_s16, %s1228_s29, %s1228_s29, %s1229_s18  }
 0x48f PF: > { %s768_s22 = sand.u32 1, %s1201_s12   ;;  %p1545_p2 = scmp.ne.s32.totalorder %s1534_s19, 0 }
 0x490   : > { %p1546_p5 = scmp.ge.s32.totalorder %s1213_s15, 2  ;;  %s769_s5 = scalar_lea.sflag [#allocation4], %s768_s22 }
 0x492   : > { %p974_p1 = pnand %p1546_p5, %p1545_p2 }
 0x494   : > { %1196 = dma.done.wait (!%p974_p1), %s769_s5, 512  }
 0x495   : > { %1198 = vsyncadd (!%p974_p1), %s769_s5, 4294966784  ;;  %p19_p6 = scmp.ge.s32.totalorder %s1306_s24, 4   ;;  %s1547_s12 = smov %s1205_s13 }
 0x496   : > { %s1548_s13 = smov %s1209_s14  ;;  %s1549_s14 = smov %s1337_s17 }
 0x497   : > { %s1550_s15 = smov %s1306_s24  ;;  %21 = sbr.rel (!%p19_p6) target bundleno = 9 (0x9), region = 95 }
 0x49e   :  { %774 = vsyncpa [#allocation3], 1 }
 0x49f   :  { %776 = vsyncpa [#allocation3 + $0x1], 1 }
 0x4a0   :  { %777 = vsyncpa [#allocation6], 1 }
 0x4a1   :  { %779 = vsyncpa [#allocation6 + $0x1], 1 }
 0x4a2   :  { %780 = vsyncpa [#allocation4], 1 }
 0x4a3   :  { %782 = vsyncpa [#allocation4 + $0x1], 1 }

</bundles_post_ra>
